<compile_context>
chip_gen: v7x
topology: tpu7x:2x2x1
jax: 0.10.0
libtpu: 0.0.40
codegen_flags: <defaults>
</compile_context>

<pallas_src>
import jax
import jax.numpy as jnp
from jax import lax
from jax.experimental import pallas as pl
from jax.experimental.pallas import tpu as pltpu

_LANE = 128
_MAX_TILE_BYTES = 2 * 1024 * 1024  # ~2 MiB per operand per block


def _round_up(a, b):
    return ((a + b - 1) // b) * b


def _softexp_kernel(scal_ref, x_ref, o_ref):
    # scal_ref: SMEM (2,) f32 -> [alpha, 1/alpha]; x_ref/o_ref: VMEM (block_rows, 128) tiles.
    alpha = scal_ref[0]
    inv_alpha = scal_ref[1]

    @pl.when(alpha == 0.0)
    def _():
        # Identity (normally short-circuited in the wrapper; kept for robustness).
        o_ref[...] = x_ref[...]

    @pl.when(alpha < 0.0)
    def _():
        x = x_ref[...].astype(jnp.float32)
        out = -jnp.log(1.0 - alpha * (x + alpha)) * inv_alpha
        o_ref[...] = out.astype(o_ref.dtype)

    @pl.when(alpha > 0.0)
    def _():
        x = x_ref[...].astype(jnp.float32)
        out = (jnp.exp(alpha * x) - 1.0) * inv_alpha + alpha
        o_ref[...] = out.astype(o_ref.dtype)


def _softexp_pallas(x2d, scal, block_rows, n_elems, itemsize, out_dtype):
    rows = x2d.shape[0]
    grid = (pl.cdiv(rows, block_rows),)
    cost = pl.CostEstimate(
        flops=5 * n_elems,
        transcendentals=n_elems,
        bytes_accessed=2 * n_elems * itemsize,
    )
    return pl.pallas_call(
        _softexp_kernel,
        out_shape=jax.ShapeDtypeStruct((rows, _LANE), out_dtype),
        grid=grid,
        in_specs=[
            pl.BlockSpec(memory_space=pltpu.MemorySpace.SMEM),       # [alpha, 1/alpha]
            pl.BlockSpec((block_rows, _LANE), lambda i: (i, 0)),     # x tile (partial last ok)
        ],
        out_specs=pl.BlockSpec((block_rows, _LANE), lambda i: (i, 0)),
        compiler_params=pltpu.CompilerParams(
            dimension_semantics=("parallel",)),
        cost_estimate=cost,
    )(scal, x2d)


def softexp(x, alpha):
    """SoftExp activation. x: any-shape array (NCHW in the demo). alpha: scalar."""
    orig_shape = x.shape
    dtype = x.dtype
    itemsize = jnp.dtype(dtype).itemsize
    # Sublane multiple depends on element width (8 for 32-bit, 16 for 16-bit, 32 for 8-bit).
    sub = {4: 8, 2: 16, 1: 32}.get(itemsize, 8)

    flat = x.reshape(-1)
    n = flat.shape[0]

    # Pad only to the minimal (sub * 128) boundary; often this is a zero pad.
    padded_n = _round_up(max(n, 1), sub * _LANE)
    pad = padded_n - n
    if pad:
        flat = jnp.pad(flat, (0, pad))
    rows = padded_n // _LANE
    x2d = flat.reshape(rows, _LANE)

    # Block size: ~2 MiB of bytes per operand (dtype-scaled), at least 2 grid steps
    # whenever possible (both v7x TensorCores); final block may be partial.
    max_rows = max(sub, (_MAX_TILE_BYTES // (_LANE * itemsize)) // sub * sub)
    target_rows = _round_up(pl.cdiv(rows, 2), sub)
    block_rows = max(sub, min(max_rows, target_rows, rows))

    # Scalars: alpha and a precomputed reciprocal (safe even when alpha == 0).
    a = jnp.asarray(alpha, jnp.float32)
    safe = jnp.where(a == 0.0, jnp.float32(1.0), a)
    scal = jnp.stack([a, 1.0 / safe])

    def run_kernel(xx):
        return _softexp_pallas(xx, scal, block_rows, n, itemsize, dtype)

    # alpha == 0 returns x unchanged in the module: skip the kernel (and its HBM traffic).
    out2d = lax.cond(a == 0.0, lambda xx: xx, run_kernel, x2d)

    flat_out = out2d.reshape(-1)
    if pad:
        flat_out = flat_out[:n]
    return flat_out.reshape(orig_shape)


softexp_jit = jax.jit(softexp)


def _softexp_ref(x, alpha):
    """Pure-JAX reference matching the PyTorch forward."""
    xf = x.astype(jnp.float32)
    a = jnp.asarray(alpha, jnp.float32)
    safe = jnp.where(a == 0.0, 1.0, a)
    neg = -jnp.log(1.0 - a * (xf + a)) / safe
    pos = (jnp.exp(a * xf) - 1.0) / safe + a
    out = jnp.where(a == 0.0, xf, jnp.where(a < 0.0, neg, pos))
    return out.astype(x.dtype)


if __name__ == "__main__":
    key = jax.random.PRNGKey(0)
    k1, k2 = jax.random.split(key)
    # NCHW inputs bounded to the function's domain for all tested alphas
    # (log argument stays positive), so the comparison is NaN-free.
    x_main = jax.random.uniform(k1, (2, 4, 16, 16), dtype=jnp.float32,
                                minval=-1.0, maxval=1.0)
    # A non-128-aligned shape to exercise the pad / partial-block path.
    x_odd = jax.random.uniform(k2, (3, 5, 7, 11), dtype=jnp.float32,
                               minval=-1.0, maxval=1.0)

    ok = True
    for x in (x_main, x_odd):
        # Default parameter init alpha=0.0, plus the alpha>0 and alpha<0 branches.
        for alpha_val in (0.0, 0.5, -0.5):
            alpha = jnp.float32(alpha_val)
            out = softexp_jit(x, alpha)
            out = jax.block_until_ready(out)
            ref = _softexp_ref(x, alpha)
            ok = ok and bool(jnp.allclose(out, ref, atol=1e-5, rtol=1e-5,
                                          equal_nan=True))
            assert out.shape == x.shape and out.dtype == x.dtype

    # TODO(synk): alpha is a trainable nn.Parameter in the module; only the forward
    # pass is implemented here (no custom VJP for the Pallas kernel).
    if ok:
        print("KERNEL_OK")
    else:
        print("MISMATCH")
</pallas_src>

<mosaic_0001>
module attributes {stable_mosaic.version = 11 : i64} {
  func.func @_softexp_kernel(%arg0: i32, %arg1: memref<2xf32, #tpu.memory_space<smem>>, %arg2: memref<8x128xf32, #tpu.memory_space<vmem>>, %arg3: memref<8x128xf32, #tpu.memory_space<vmem>>) attributes {dimension_semantics = [#tpu.dimension_semantics<parallel>], iteration_bounds = array<i64: 2>, scalar_prefetch = 0 : i64, scratch_operands = 0 : i64, tpu.core_type = #tpu.core_type<tc>, window_params = [{transform_indices = @transform_0, window_bounds = array<i64: 2>}, {transform_indices = @transform_1, window_bounds = array<i64: 8, 128>}, {transform_indices = @transform_2, window_bounds = array<i64: 8, 128>}]} {
    %c0 = arith.constant 0 : index
    %0 = memref.load %arg1[%c0] : memref<2xf32, #tpu.memory_space<smem>>
    %c1 = arith.constant 1 : index
    %1 = memref.load %arg1[%c1] : memref<2xf32, #tpu.memory_space<smem>>
    %cst = arith.constant 0.000000e+00 : f32
    %2 = arith.cmpf oeq, %0, %cst : f32
    %3 = arith.extui %2 : i1 to i32
    %c0_i32 = arith.constant 0 : i32
    %4 = arith.cmpi ne, %3, %c0_i32 : i32
    scf.if %4 {
      %c0_4 = arith.constant 0 : index
      %c0_5 = arith.constant 0 : index
      %11 = vector.load %arg2[%c0_4, %c0_5] : memref<8x128xf32, #tpu.memory_space<vmem>>, vector<8x128xf32>
      %c0_6 = arith.constant 0 : index
      %c0_7 = arith.constant 0 : index
      %12 = vector.load %arg3[%c0_6, %c0_7] : memref<8x128xf32, #tpu.memory_space<vmem>>, vector<8x128xf32>
      tpu.vector_store %arg3[%c0_6, %c0_7], %11 {strides = array<i32>} : memref<8x128xf32, #tpu.memory_space<vmem>>, vector<8x128xf32>,
    } else {
    }
    %cst_0 = arith.constant 0.000000e+00 : f32
    %5 = arith.cmpf olt, %0, %cst_0 : f32
    %6 = arith.extui %5 : i1 to i32
    %c0_i32_1 = arith.constant 0 : i32
    %7 = arith.cmpi ne, %6, %c0_i32_1 : i32
    scf.if %7 {
      %c0_4 = arith.constant 0 : index
      %c0_5 = arith.constant 0 : index
      %11 = vector.load %arg2[%c0_4, %c0_5] : memref<8x128xf32, #tpu.memory_space<vmem>>, vector<8x128xf32>
      %12 = vector.broadcast %0 : f32 to vector<8x128xf32>
      %13 = arith.addf %11, %12 : vector<8x128xf32>
      %14 = vector.broadcast %0 : f32 to vector<8x128xf32>
      %15 = arith.mulf %14, %13 : vector<8x128xf32>
      %cst_6 = arith.constant 1.000000e+00 : f32
      %16 = vector.broadcast %cst_6 : f32 to vector<8x128xf32>
      %17 = arith.subf %16, %15 : vector<8x128xf32>
      %18 = math.log %17 : vector<8x128xf32>
      %cst_7 = arith.constant 0.000000e+00 : f32
      %19 = vector.broadcast %cst_7 : f32 to vector<8x128xf32>
      %20 = arith.subf %19, %18 : vector<8x128xf32>
      %21 = vector.broadcast %1 : f32 to vector<8x128xf32>
      %22 = arith.mulf %20, %21 : vector<8x128xf32>
      %c0_8 = arith.constant 0 : index
      %c0_9 = arith.constant 0 : index
      %23 = vector.load %arg3[%c0_8, %c0_9] : memref<8x128xf32, #tpu.memory_space<vmem>>, vector<8x128xf32>
      tpu.vector_store %arg3[%c0_8, %c0_9], %22 {strides = array<i32>} : memref<8x128xf32, #tpu.memory_space<vmem>>, vector<8x128xf32>,
    } else {
    }
    %cst_2 = arith.constant 0.000000e+00 : f32
    %8 = arith.cmpf ogt, %0, %cst_2 : f32
    %9 = arith.extui %8 : i1 to i32
    %c0_i32_3 = arith.constant 0 : i32
    %10 = arith.cmpi ne, %9, %c0_i32_3 : i32
    scf.if %10 {
      %c0_4 = arith.constant 0 : index
      %c0_5 = arith.constant 0 : index
      %11 = vector.load %arg2[%c0_4, %c0_5] : memref<8x128xf32, #tpu.memory_space<vmem>>, vector<8x128xf32>
      %12 = vector.broadcast %0 : f32 to vector<8x128xf32>
      %13 = arith.mulf %12, %11 : vector<8x128xf32>
      %14 = math.exp %13 : vector<8x128xf32>
      %cst_6 = arith.constant 1.000000e+00 : f32
      %15 = vector.broadcast %cst_6 : f32 to vector<8x128xf32>
      %16 = arith.subf %14, %15 : vector<8x128xf32>
      %17 = vector.broadcast %1 : f32 to vector<8x128xf32>
      %18 = arith.mulf %16, %17 : vector<8x128xf32>
      %19 = vector.broadcast %0 : f32 to vector<8x128xf32>
      %20 = arith.addf %18, %19 : vector<8x128xf32>
      %c0_7 = arith.constant 0 : index
      %c0_8 = arith.constant 0 : index
      %21 = vector.load %arg3[%c0_7, %c0_8] : memref<8x128xf32, #tpu.memory_space<vmem>>, vector<8x128xf32>
      tpu.vector_store %arg3[%c0_7, %c0_8], %20 {strides = array<i32>} : memref<8x128xf32, #tpu.memory_space<vmem>>, vector<8x128xf32>,
    } else {
    }
    return
  }
  func.func @transform_0(%arg0: i32) -> i32 {
    %c0_i32 = arith.constant 0 : i32
    %c0_i32_0 = arith.constant 0 : i32
    return %c0_i32 : i32
  }
  func.func @transform_1(%arg0: i32) -> (i32, i32) {
    %c0_i32 = arith.constant 0 : i32
    %c0_i32_0 = arith.constant 0 : i32
    return %arg0, %c0_i32 : i32, i32
  }
  func.func @transform_2(%arg0: i32) -> (i32, i32) {
    %c0_i32 = arith.constant 0 : i32
    %c0_i32_0 = arith.constant 0 : i32
    return %arg0, %c0_i32 : i32, i32
  }
}

</mosaic_0001>

<bundles_post_ra>
// kernel: branch_0_fun.1
= control target key start
LH: loop header
LB: loop body
LE: loop exit
PB: predicated region body
PF: predicated region fallthrough
CT: control target
= control target key end

     0   :  { %7 = vsyncpa [#allocation3], 0  ;;  %s334_s9 = smov 0   ;;  %s381_s0 = inlined_call_operand.vmem [shape: f32[2], index: 0, kind: input, shape index: {}]   ;;  %s382_s1 = inlined_call_operand.vmem [shape: f32[16,128], index: 1, kind: input, shape index: {}]   ;;  %s383_s2 = inlined_call_operand.vmem [shape: f32[16,128], index: 2, kind: output, shape index: {}]  }
   0x1 LB: > { %s255_s10 = sadd.s32 4294967295, %s316_s9   ;;  %p257_p0 = scmp.ge.s32.totalorder %s316_s9, 1  ;;  %s316_s9 = sphi %s334_s9, %s13_s9  }
   0x2   : > { %p91_p1 = scmp.lt.s32.totalorder %s316_s9, 3  ;;  %s104_s13 = sshll.u32 %s381_s0, 4  ;;  %s105_s13 = int_to_ptr.vmem [resolvable:$true] %s104_s13 }
   0x3   : > { %p276_p3 = scmp.eq.s32.totalorder %s255_s10, 0  ;;  %s291_s15 = scalar_lea.vmem %s105_s13, 16 }
   0x4   : > { %p345_p2 = pnand %p257_p0, %p91_p1  ;;  %p292_p6 = scmp.ne.s32.totalorder %s105_s13, %s291_s15 }
   0x5   : > { %p299_p10 = scmp.lt.s32.totalorder %s105_s13, %s105_s13  ;;  %p300_p11 = scmp.lt.s32.totalorder %s291_s15, %s291_s15 }
   0x6   : > { %p272_p4 = pneg %p345_p2 }
   0x7   : > { %p301_p12 = por %p300_p11, %p299_p10 }
   0x8   : > { %p273_p5 = pnand %p276_p3, %p272_p4 }
   0xa   : > { %p293_p7 = pneg %p273_p5 }
   0xc   : > { %p294_p8 = pnand %p293_p7, %p292_p6 }
   0xe   : > { %p295_p9 = pneg %p294_p8 }
  0x10   : > { %p302_p13 = pnand %p301_p12, %p295_p9 }
  0x12   : > { %305 = shalt.err (!%p302_p13)
}
  0x13   : > { %s318_s16 = smov [#allocation2]   ;;  %124 = sbr.rel (%p345_p2) target bundleno = 94 (0x5e), region = 28 }
  0x14   : > { %275 = dma.vmem_to_smem (!%p273_p5), %s105_s13, 16, %s318_s16, [#allocation3]  }
  0x1a   : > { %311 = dma.done.wait (%p276_p3), [#allocation3], 16  }
  0x1b   : > { %313 = vsyncadd (%p276_p3), [#allocation3], 4294967280 }
  0x1c   : > { %130 = sfence }
  0x1d   : > { %p145_p0 = scmp.lt.s32.totalorder %s255_s10, 1  ;;  %s356_s17 = sld [smem:[#allocation2]] }
  0x1e   : > { %s358_s18 = sld [smem:[#allocation2 + $0x1]] }
  0x1f   : > { %s386_s10 = smov (!%p145_p0, %s255_s10), 1 }
  0x20   : > { %s262_s19 = sshll.u32 %s386_s10, 3 }
  0x21   : > { %s148_s22 = scalar_lea.vmem %s382_s1, %s262_s19  ;;  %s366_s25 = scalar_lea.vmem %s383_s2, %s262_s19 }
  0x23   : > { %p155_p1 = scmp.eq.f32.partialorder %s356_s17, 0.0 }
  0x24   : > { %v159_v0 = vld [vmem:[%s148_s22] sm:$0xff] (%p155_p1) }
  0x25   : > { %158 = sbr.rel (!%p155_p1) target bundleno = 44 (0x2c), region = 36  ;;  %160 = vst [vmem:[%s366_s25] sm:$0xff] (%p155_p1), %v159_v0 }
  0x2c PF: > { %p161_p2 = scmp.lt.f32.partialorder %s356_s17, 0.0 }
  0x2d   : > { %v165_v1 = vld [vmem:[%s148_s22] sm:$0xff] (%p161_p2)  ;;  %v166_v2 = vstv (%p161_p2), %s356_s17  ;;  %v173_v8 = vstv (%p161_p2), %s358_s18 }
  0x2e   : > { %164 = sbr.rel (!%p161_p2) target bundleno = 70 (0x46), region = 40  ;;  %v167_v3 = vadd.f32 (%p161_p2), %v166_v2, %v165_v1 }
  0x30   : > { %v168_v4 = vmul.f32 (%p161_p2), %v167_v3, %v166_v2 }
  0x32   : > { %v169_v5 = vsub.f32 (%p161_p2), 1.0, %v168_v4 }
  0x34   : > { %287 = vlog2.f32 (%p161_p2), %v169_v5 }
  0x3e   : > { %v288_v6 = vpop.eup %287 }
  0x3f   : > { %v171_v7 = vmul.f32 0.6931472, %v288_v6 }
  0x41   : > { %v172_v9 = vsub.f32 0.0, %v171_v7 }
  0x43   : > { %v174_v10 = vmul.f32 %v173_v8, %v172_v9 }
  0x45   : > { %175 = vst [vmem:[%s366_s25] sm:$0xff] %v174_v10 }
  0x46 PF: > { %p176_p3 = scmp.gt.f32.partialorder %s356_s17, 0.0 }
  0x47   : > { %v180_v11 = vld [vmem:[%s148_s22] sm:$0xff] (%p176_p3)  ;;  %v181_v12 = vstv (%p176_p3), %s356_s17  ;;  %v186_v16 = vstv (%p176_p3), %s358_s18 }
  0x48   : > { %179 = sbr.rel (!%p176_p3) target bundleno = 94 (0x5e), region = 44  ;;  %v182_v13 = vmul.f32 (%p176_p3), %v181_v12, %v180_v11 }
  0x4a   : > { %v183_v14 = vmul.f32 (%p176_p3), 1.442695, %v182_v13 }
  0x4c   : > { %289 = vpow2.f32 (%p176_p3), %v183_v14 }
  0x56   : > { %v290_v15 = vpop.eup %289 }
  0x57   : > { %v265_v17 = vadd.f32 -1.0, %v290_v15 }
  0x59   : > { %v187_v18 = vmul.f32 %v265_v17, %v186_v16 }
  0x5b   : > { %v188_v19 = vadd.f32 %v187_v18, %v181_v12 }
  0x5d   : > { %189 = vst [vmem:[%s366_s25] sm:$0xff] %v188_v19 }
  0x5e PF: > { %s13_s9 = sadd.s32 1, %s316_s9  }
  0x5f   : > { %p10_p4 = scmp.ge.s32.totalorder %s13_s9, 4  }
  0x61   :  { %12 = sbr.rel (!%p10_p4) target bundleno = 1 (0x1), region = 75 }
  0x68   :  { %209 = vsyncpa [#allocation3], 1 }
  0x69   :  { %211 = vsyncpa [#allocation3 + $0x1], 1 }

</bundles_post_ra>
